<compile_context>
chip_gen: v7x
topology: tpu7x:2x2x1
jax: 0.10.0
libtpu: 0.0.40
codegen_flags: <defaults>
</compile_context>

<pallas_src>
import functools

import jax
import jax.numpy as jnp
from jax.experimental import pallas as pl
from jax.experimental.pallas import tpu as pltpu

EPS = 1e-6


def _round_up(v, m):
    return (v + m - 1) // m * m


def _sublayer_connection_kernel(xf_ref, w_ref, wb_ref, g_ref, b_ref,
                                o_ref, normed_ref, *, tn, n_cols, approx):
    # xf_ref : (TM, D)  full-width rows (LayerNorm stats + residual source)
    # w_ref  : (D, TN)  linear weight column block (compute dtype)
    # wb_ref : (1, TN)  linear bias column block (f32)
    # g_ref, b_ref : (1, D) LayerNorm a_2 / b_2 (f32)
    # o_ref  : (TM, TN) output block
    # normed_ref : (TM, D) VMEM scratch caching LayerNorm output across column steps
    j = pl.program_id(1)

    @pl.when(j == 0)
    def _():
        x = xf_ref[...].astype(jnp.float32)
        d = x.shape[-1]
        n = float(d)
        # Single-pass statistics: sum and sum-of-squares (one traversal, one reduce pair).
        s = jnp.sum(x, axis=-1, keepdims=True)
        ssq = jnp.sum(x * x, axis=-1, keepdims=True)
        mean = s * (1.0 / n)
        denom = float(max(d - 1, 1))  # torch unbiased std (guard d == 1)
        var_unb = jnp.maximum((ssq - n * mean * mean) * (1.0 / denom), 0.0)
        std = jnp.sqrt(var_unb)
        diff = x - mean
        if approx:
            inv = pl.reciprocal(std + EPS, approx=True)  # EUP slot, off the VPU path
            normed = g_ref[...] * diff * inv + b_ref[...]
        else:
            normed = g_ref[...] * diff / (std + EPS) + b_ref[...]
        normed_ref[...] = normed.astype(normed_ref.dtype)

    # Sublayer = Linear(D, D) column block: normed @ W[:, j-block] + bias (MXU, f32 acc).
    sub = jnp.dot(normed_ref[...], w_ref[...], preferred_element_type=jnp.float32)
    sub = sub + wb_ref[...]

    # Residual comes from the already-resident full-width x block (x is DMA'd once).
    if n_cols == 1:
        xres = xf_ref[...]
    else:
        start = pl.multiple_of(j * tn, 128)
        xres = xf_ref[:, pl.ds(start, tn)]

    # Dropout (eval mode) is identity; residual add.
    o_ref[...] = (xres.astype(jnp.float32) + sub).astype(o_ref.dtype)


def sublayer_connection(x, w, wb, gamma, beta, *, tile_rows=512, compute_dtype=None):
    """x: (B, S, D); w: (D, D) laid out for `normed @ w`; wb/gamma/beta: (D,)."""
    B, S, D = x.shape
    R = B * S

    if compute_dtype is None:
        # bf16 MXU operands pay off for realistic hidden sizes; tiny D stays exact f32.
        compute_dtype = jnp.bfloat16 if D >= 512 else jnp.float32
    approx = jnp.dtype(compute_dtype) == jnp.dtype(jnp.bfloat16)

    w_item = jnp.dtype(compute_dtype).itemsize
    x_item = jnp.dtype(x.dtype).itemsize
    o_item = x_item

    # Generation-aware VMEM budget (v7x: 64 MiB per TC; v5e/v6e: 128 MiB).
    try:
        cap = int(pltpu.get_tpu_info().vmem_capacity_bytes)
    except Exception:
        cap = 128 * 1024 * 1024
    budget = int(min((cap * 3) // 4, 100 * 1024 * 1024))

    # Row tile: large tiles amortize per-step overhead and weight re-streams; multiple
    # of 16 so the bf16 scratch keeps sublane packing clean.
    tm = min(_round_up(tile_rows, 16), _round_up(R, 16))
    # Megacore (v7x has 2 TCs on the 'parallel' axis): keep >= 2 row tiles when possible.
    if _round_up(R, tm) // tm < 2 and R >= 32:
        tm = _round_up((R + 1) // 2, 16)

    def footprint(tm_, tn_, n_cols_):
        w_bufs = 1 if n_cols_ == 1 else 2  # invariant weight can be single-buffered
        return (w_bufs * D * tn_ * w_item      # weight block(s)
                + 2 * tm_ * D * x_item         # full-width x rows (double-buffered)
                + 2 * tm_ * tn_ * o_item       # output block (double-buffered)
                + tm_ * D * w_item             # LayerNorm-output scratch
                + 4 * tn_ * 4                  # linear bias block
                + 4 * D * 4)                   # gamma / beta

    # Column-tile the weight only when a VMEM-resident (D, D) weight does not fit.
    tn, n_cols = D, 1
    if footprint(tm, tn, n_cols) > budget and D % 256 == 0:
        for cand in (2048, 1024, 512, 256):  # multiples of 256 keep v6e/v7x MXU fed
            if D % cand == 0:
                tn, n_cols = cand, D // cand
                if footprint(tm, tn, n_cols) <= budget:
                    break
    # Last resort for the tightest budgets (e.g. v7x + huge D): shrink the row tile.
    while footprint(tm, tn, n_cols) > budget and tm > 128:
        tm = max(_round_up(tm // 2, 16), 128)

    Rp = _round_up(R, tm)
    n_row_tiles = Rp // tm
    grid = (n_row_tiles, n_cols)

    x2 = x.reshape(R, D)
    if Rp != R:
        x2 = jnp.pad(x2, ((0, Rp - R), (0, 0)))  # padded rows are discarded afterwards

    w_c = w.astype(compute_dtype)
    wb2 = wb.reshape(1, D).astype(jnp.float32)
    g2 = gamma.reshape(1, D).astype(jnp.float32)
    b2 = beta.reshape(1, D).astype(jnp.float32)

    # Actual HBM traffic: x read once; weight re-streamed per row tile only if tiled.
    w_hbm = D * D * w_item * (1 if n_cols == 1 else n_row_tiles)
    cost = pl.CostEstimate(
        flops=2 * Rp * D * D + 10 * Rp * D,
        transcendentals=2 * Rp,
        bytes_accessed=int(Rp * D * x_item + w_hbm + Rp * D * o_item + 4 * D * 4),
    )

    vmem_limit = int(min(budget, max(2 * footprint(tm, tn, n_cols), 32 * 1024 * 1024)))

    kernel = functools.partial(_sublayer_connection_kernel,
                               tn=tn, n_cols=n_cols, approx=approx)

    def run(single_buffer):
        def spec(shape, imap, invariant=False):
            if invariant and single_buffer:
                # Constant index_map -> no re-fetch; single buffer halves residency.
                return pl.BlockSpec(shape, imap, pipeline_mode=pl.Buffered(1))
            return pl.BlockSpec(shape, imap)

        w_invariant = n_cols == 1
        grid_spec = pltpu.PrefetchScalarGridSpec(
            num_scalar_prefetch=0,
            grid=grid,
            in_specs=[
                spec((tm, D), lambda i, j: (i, 0)),               # x rows (LN + residual)
                spec((D, tn), lambda i, j: (0, j), w_invariant),  # linear weight block
                spec((1, tn), lambda i, j: (0, j), w_invariant),  # linear bias block
                spec((1, D), lambda i, j: (0, 0), True),          # layernorm gamma (a_2)
                spec((1, D), lambda i, j: (0, 0), True),          # layernorm beta  (b_2)
            ],
            out_specs=pl.BlockSpec((tm, tn), lambda i, j: (i, j)),
            scratch_shapes=[pltpu.VMEM((tm, D), compute_dtype)],
        )
        return pl.pallas_call(
            kernel,
            out_shape=jax.ShapeDtypeStruct((Rp, D), x.dtype),
            grid_spec=grid_spec,
            compiler_params=pltpu.CompilerParams(
                dimension_semantics=("parallel", "arbitrary"),
                vmem_limit_bytes=vmem_limit,
            ),
            cost_estimate=cost,
        )(x2, w_c, wb2, g2, b2)

    try:
        out = run(single_buffer=True)
    except Exception:
        # pipeline_mode=pl.Buffered(1) not supported by this jax build; use defaults.
        out = run(single_buffer=False)

    return out[:R].reshape(B, S, D)


def _reference(x, w, wb, gamma, beta):
    x32 = x.astype(jnp.float32)
    d = x.shape[-1]
    mean = jnp.mean(x32, axis=-1, keepdims=True)
    diff = x32 - mean
    var_unb = jnp.sum(diff * diff, axis=-1, keepdims=True) / max(d - 1, 1)
    std = jnp.sqrt(var_unb)
    normed = gamma * diff / (std + EPS) + beta
    sub = normed @ w + wb
    return (x32 + sub).astype(x.dtype)


if __name__ == "__main__":
    key = jax.random.PRNGKey(0)
    B, S, D = 2, 8, 32  # batch=2, seq=8, hidden=32

    k_x, k_w, k_b = jax.random.split(key, 3)
    x = jax.random.normal(k_x, (B, S, D), dtype=jnp.float32)

    # Deterministic synthetic parameters (shapes from the module's __init__):
    # LayerNorm: a_2 = ones(D), b_2 = zeros(D); sublayer is a Linear(D, D).
    gamma = jnp.ones((D,), dtype=jnp.float32)
    beta = jnp.zeros((D,), dtype=jnp.float32)
    w = jax.random.normal(k_w, (D, D), dtype=jnp.float32) * 0.05
    wb = jax.random.normal(k_b, (D,), dtype=jnp.float32) * 0.01

    out = sublayer_connection(x, w, wb, gamma, beta)
    out = jax.block_until_ready(out)

    ref = _reference(x, w, wb, gamma, beta)
    assert out.shape == (B, S, D)
    # Small-D demo uses f32 operands + exact divide, so the tolerance can be tight.
    assert jnp.allclose(out, ref, atol=1e-3, rtol=1e-3), "mismatch vs reference"

    print("KERNEL_OK")
</pallas_src>

<mosaic_0001>
module attributes {stable_mosaic.version = 11 : i64} {
  func.func @_sublayer_connection_kernel(%arg0: i32, %arg1: i32, %arg2: memref<16x32xf32, #tpu.memory_space<vmem>>, %arg3: memref<32x32xf32, #tpu.memory_space<vmem>>, %arg4: memref<1x32xf32, #tpu.memory_space<vmem>>, %arg5: memref<1x32xf32, #tpu.memory_space<vmem>>, %arg6: memref<1x32xf32, #tpu.memory_space<vmem>>, %arg7: memref<16x32xf32, #tpu.memory_space<vmem>>, %arg8: memref<16x32xf32, #tpu.memory_space<vmem>>) attributes {dimension_semantics = [#tpu.dimension_semantics<parallel>, #tpu.dimension_semantics<arbitrary>], iteration_bounds = array<i64: 1, 1>, scalar_prefetch = 0 : i64, scratch_operands = 1 : i64, tpu.core_type = #tpu.core_type<tc>, window_params = [{transform_indices = @transform_0, window_bounds = array<i64: 16, 32>}, {pipeline_mode = #tpu.pipeline_mode<synchronous>, transform_indices = @transform_1, window_bounds = array<i64: 32, 32>}, {pipeline_mode = #tpu.pipeline_mode<synchronous>, transform_indices = @transform_2, window_bounds = array<i64: 1, 32>}, {pipeline_mode = #tpu.pipeline_mode<synchronous>, transform_indices = @transform_3, window_bounds = array<i64: 1, 32>}, {pipeline_mode = #tpu.pipeline_mode<synchronous>, transform_indices = @transform_4, window_bounds = array<i64: 1, 32>}, {transform_indices = @transform_5, window_bounds = array<i64: 16, 32>}]} {
    %c0_i32 = arith.constant 0 : i32
    %0 = arith.cmpi eq, %arg1, %c0_i32 : i32
    %1 = arith.extui %0 : i1 to i32
    %c0_i32_0 = arith.constant 0 : i32
    %2 = arith.cmpi ne, %1, %c0_i32_0 : i32
    scf.if %2 {
      %c0_10 = arith.constant 0 : index
      %c0_11 = arith.constant 0 : index
      %12 = vector.load %arg2[%c0_10, %c0_11] : memref<16x32xf32, #tpu.memory_space<vmem>>, vector<16x32xf32>
      %cst_12 = arith.constant dense<0.000000e+00> : vector<16xf32>
      %13 = vector.multi_reduction <add>, %12, %cst_12 [1] : vector<16x32xf32> to vector<16xf32>
      %14 = vector.shape_cast %13 : vector<16xf32> to vector<16x1xf32>
      %15 = arith.mulf %12, %12 : vector<16x32xf32>
      %cst_13 = arith.constant dense<0.000000e+00> : vector<16xf32>
      %16 = vector.multi_reduction <add>, %15, %cst_13 [1] : vector<16x32xf32> to vector<16xf32>
      %17 = vector.shape_cast %16 : vector<16xf32> to vector<16x1xf32>
      %cst_14 = arith.constant 3.125000e-02 : f32
      %18 = vector.broadcast %cst_14 : f32 to vector<16x1xf32>
      %19 = arith.mulf %14, %18 : vector<16x1xf32>
      %cst_15 = arith.constant 3.200000e+01 : f32
      %20 = vector.broadcast %cst_15 : f32 to vector<16x1xf32>
      %21 = arith.mulf %20, %19 : vector<16x1xf32>
      %22 = arith.mulf %21, %19 : vector<16x1xf32>
      %23 = arith.subf %17, %22 : vector<16x1xf32>
      %cst_16 = arith.constant 0.0322580636 : f32
      %24 = vector.broadcast %cst_16 : f32 to vector<16x1xf32>
      %25 = arith.mulf %23, %24 : vector<16x1xf32>
      %cst_17 = arith.constant 0.000000e+00 : f32
      %26 = vector.broadcast %cst_17 : f32 to vector<16x1xf32>
      %27 = arith.maximumf %25, %26 : vector<16x1xf32>
      %28 = math.sqrt %27 : vector<16x1xf32>
      %29 = vector.broadcast %19 : vector<16x1xf32> to vector<16x32xf32>
      %30 = arith.subf %12, %29 : vector<16x32xf32>
      %c0_18 = arith.constant 0 : index
      %c0_19 = arith.constant 0 : index
      %31 = vector.load %arg5[%c0_18, %c0_19] : memref<1x32xf32, #tpu.memory_space<vmem>>, vector<1x32xf32>
      %32 = vector.broadcast %31 : vector<1x32xf32> to vector<16x32xf32>
      %33 = arith.mulf %32, %30 : vector<16x32xf32>
      %cst_20 = arith.constant 9.99999997E-7 : f32
      %34 = vector.broadcast %cst_20 : f32 to vector<16x1xf32>
      %35 = arith.addf %28, %34 : vector<16x1xf32>
      %36 = vector.broadcast %35 : vector<16x1xf32> to vector<16x32xf32>
      %37 = arith.divf %33, %36 : vector<16x32xf32>
      %c0_21 = arith.constant 0 : index
      %c0_22 = arith.constant 0 : index
      %38 = vector.load %arg6[%c0_21, %c0_22] : memref<1x32xf32, #tpu.memory_space<vmem>>, vector<1x32xf32>
      %39 = vector.broadcast %38 : vector<1x32xf32> to vector<16x32xf32>
      %40 = arith.addf %37, %39 : vector<16x32xf32>
      %c0_23 = arith.constant 0 : index
      %c0_24 = arith.constant 0 : index
      %41 = vector.load %arg8[%c0_23, %c0_24] : memref<16x32xf32, #tpu.memory_space<vmem>>, vector<16x32xf32>
      tpu.vector_store %arg8[%c0_23, %c0_24], %40 {strides = array<i32>} : memref<16x32xf32, #tpu.memory_space<vmem>>, vector<16x32xf32>,
    } else {
    }
    %c0 = arith.constant 0 : index
    %c0_1 = arith.constant 0 : index
    %3 = vector.load %arg8[%c0, %c0_1] : memref<16x32xf32, #tpu.memory_space<vmem>>, vector<16x32xf32>
    %c0_2 = arith.constant 0 : index
    %c0_3 = arith.constant 0 : index
    %4 = vector.load %arg3[%c0_2, %c0_3] : memref<32x32xf32, #tpu.memory_space<vmem>>, vector<32x32xf32>
    %cst = arith.constant dense<0.000000e+00> : vector<16x32xf32>
    %5 = tpu.matmul %3, %4, %cst {dimension_numbers = #tpu.dot_dimension_numbers<[1], [0], [0], [1], [0, 0, 1, 1], [], []>} : vector<16x32xf32>, vector<32x32xf32>, vector<16x32xf32> -> vector<16x32xf32>
    %c0_4 = arith.constant 0 : index
    %c0_5 = arith.constant 0 : index
    %6 = vector.load %arg4[%c0_4, %c0_5] : memref<1x32xf32, #tpu.memory_space<vmem>>, vector<1x32xf32>
    %7 = vector.broadcast %6 : vector<1x32xf32> to vector<16x32xf32>
    %8 = arith.addf %5, %7 : vector<16x32xf32>
    %c0_6 = arith.constant 0 : index
    %c0_7 = arith.constant 0 : index
    %9 = vector.load %arg2[%c0_6, %c0_7] : memref<16x32xf32, #tpu.memory_space<vmem>>, vector<16x32xf32>
    %10 = arith.addf %9, %8 : vector<16x32xf32>
    %c0_8 = arith.constant 0 : index
    %c0_9 = arith.constant 0 : index
    %11 = vector.load %arg7[%c0_8, %c0_9] : memref<16x32xf32, #tpu.memory_space<vmem>>, vector<16x32xf32>
    tpu.vector_store %arg7[%c0_8, %c0_9], %10 {strides = array<i32>} : memref<16x32xf32, #tpu.memory_space<vmem>>, vector<16x32xf32>,
    return
  }
  func.func @transform_0(%arg0: i32, %arg1: i32) -> (i32, i32) {
    %c0_i32 = arith.constant 0 : i32
    %c0_i32_0 = arith.constant 0 : i32
    return %arg0, %c0_i32 : i32, i32
  }
  func.func @transform_1(%arg0: i32, %arg1: i32) -> (i32, i32) {
    %c0_i32 = arith.constant 0 : i32
    %c0_i32_0 = arith.constant 0 : i32
    return %c0_i32, %arg1 : i32, i32
  }
  func.func @transform_2(%arg0: i32, %arg1: i32) -> (i32, i32) {
    %c0_i32 = arith.constant 0 : i32
    %c0_i32_0 = arith.constant 0 : i32
    return %c0_i32, %arg1 : i32, i32
  }
  func.func @transform_3(%arg0: i32, %arg1: i32) -> (i32, i32) {
    %c0_i32 = arith.constant 0 : i32
    %c0_i32_0 = arith.constant 0 : i32
    %c0_i32_1 = arith.constant 0 : i32
    return %c0_i32, %c0_i32_0 : i32, i32
  }
  func.func @transform_4(%arg0: i32, %arg1: i32) -> (i32, i32) {
    %c0_i32 = arith.constant 0 : i32
    %c0_i32_0 = arith.constant 0 : i32
    %c0_i32_1 = arith.constant 0 : i32
    return %c0_i32, %c0_i32_0 : i32, i32
  }
  func.func @transform_5(%arg0: i32, %arg1: i32) -> (i32, i32) {
    %c0_i32 = arith.constant 0 : i32
    return %arg0, %arg1 : i32, i32
  }
}

module attributes {stable_mosaic.version = 11 : i64} {
  func.func @_sublayer_connection_kernel(%arg0: i32, %arg1: i32, %arg2: memref<16x32xf32, #tpu.memory_space<vmem>>, %arg3: memref<32x32xf32, #tpu.memory_space<vmem>>, %arg4: memref<1x32xf32, #tpu.memory_space<vmem>>, %arg5: memref<1x32xf32, #tpu.memory_space<vmem>>, %arg6: memref<1x32xf32, #tpu.memory_space<vmem>>, %arg7: memref<16x32xf32, #tpu.memory_space<vmem>>, %arg8: memref<16x32xf32, #tpu.memory_space<vmem>>) attributes {dimension_semantics = [#tpu.dimension_semantics<parallel>, #tpu.dimension_semantics<arbitrary>], iteration_bounds = array<i64: 1, 1>, scalar_prefetch = 0 : i64, scratch_operands = 1 : i64, tpu.core_type = #tpu.core_type<tc>, window_params = [{transform_indices = @transform_0, window_bounds = array<i64: 16, 32>}, {transform_indices = @transform_1, window_bounds = array<i64: 32, 32>}, {transform_indices = @transform_2, window_bounds = array<i64: 1, 32>}, {pipeline_mode = #tpu.pipeline_mode<synchronous>, transform_indices = @transform_3, window_bounds = array<i64: 1, 32>}, {pipeline_mode = #tpu.pipeline_mode<synchronous>, transform_indices = @transform_4, window_bounds = array<i64: 1, 32>}, {transform_indices = @transform_5, window_bounds = array<i64: 16, 32>}]} {
    %c0_i32 = arith.constant 0 : i32
    %0 = arith.cmpi eq, %arg1, %c0_i32 : i32
    %1 = arith.extui %0 : i1 to i32
    %c0_i32_0 = arith.constant 0 : i32
    %2 = arith.cmpi ne, %1, %c0_i32_0 : i32
    scf.if %2 {
      %c0_10 = arith.constant 0 : index
      %c0_11 = arith.constant 0 : index
      %12 = vector.load %arg2[%c0_10, %c0_11] : memref<16x32xf32, #tpu.memory_space<vmem>>, vector<16x32xf32>
      %cst_12 = arith.constant dense<0.000000e+00> : vector<16xf32>
      %13 = vector.multi_reduction <add>, %12, %cst_12 [1] : vector<16x32xf32> to vector<16xf32>
      %14 = vector.shape_cast %13 : vector<16xf32> to vector<16x1xf32>
      %15 = arith.mulf %12, %12 : vector<16x32xf32>
      %cst_13 = arith.constant dense<0.000000e+00> : vector<16xf32>
      %16 = vector.multi_reduction <add>, %15, %cst_13 [1] : vector<16x32xf32> to vector<16xf32>
      %17 = vector.shape_cast %16 : vector<16xf32> to vector<16x1xf32>
      %cst_14 = arith.constant 3.125000e-02 : f32
      %18 = vector.broadcast %cst_14 : f32 to vector<16x1xf32>
      %19 = arith.mulf %14, %18 : vector<16x1xf32>
      %cst_15 = arith.constant 3.200000e+01 : f32
      %20 = vector.broadcast %cst_15 : f32 to vector<16x1xf32>
      %21 = arith.mulf %20, %19 : vector<16x1xf32>
      %22 = arith.mulf %21, %19 : vector<16x1xf32>
      %23 = arith.subf %17, %22 : vector<16x1xf32>
      %cst_16 = arith.constant 0.0322580636 : f32
      %24 = vector.broadcast %cst_16 : f32 to vector<16x1xf32>
      %25 = arith.mulf %23, %24 : vector<16x1xf32>
      %cst_17 = arith.constant 0.000000e+00 : f32
      %26 = vector.broadcast %cst_17 : f32 to vector<16x1xf32>
      %27 = arith.maximumf %25, %26 : vector<16x1xf32>
      %28 = math.sqrt %27 : vector<16x1xf32>
      %29 = vector.broadcast %19 : vector<16x1xf32> to vector<16x32xf32>
      %30 = arith.subf %12, %29 : vector<16x32xf32>
      %c0_18 = arith.constant 0 : index
      %c0_19 = arith.constant 0 : index
      %31 = vector.load %arg5[%c0_18, %c0_19] : memref<1x32xf32, #tpu.memory_space<vmem>>, vector<1x32xf32>
      %32 = vector.broadcast %31 : vector<1x32xf32> to vector<16x32xf32>
      %33 = arith.mulf %32, %30 : vector<16x32xf32>
      %cst_20 = arith.constant 9.99999997E-7 : f32
      %34 = vector.broadcast %cst_20 : f32 to vector<16x1xf32>
      %35 = arith.addf %28, %34 : vector<16x1xf32>
      %36 = vector.broadcast %35 : vector<16x1xf32> to vector<16x32xf32>
      %37 = arith.divf %33, %36 : vector<16x32xf32>
      %c0_21 = arith.constant 0 : index
      %c0_22 = arith.constant 0 : index
      %38 = vector.load %arg6[%c0_21, %c0_22] : memref<1x32xf32, #tpu.memory_space<vmem>>, vector<1x32xf32>
      %39 = vector.broadcast %38 : vector<1x32xf32> to vector<16x32xf32>
      %40 = arith.addf %37, %39 : vector<16x32xf32>
      %c0_23 = arith.constant 0 : index
      %c0_24 = arith.constant 0 : index
      %41 = vector.load %arg8[%c0_23, %c0_24] : memref<16x32xf32, #tpu.memory_space<vmem>>, vector<16x32xf32>
      tpu.vector_store %arg8[%c0_23, %c0_24], %40 {strides = array<i32>} : memref<16x32xf32, #tpu.memory_space<vmem>>, vector<16x32xf32>,
    } else {
    }
    %c0 = arith.constant 0 : index
    %c0_1 = arith.constant 0 : index
    %3 = vector.load %arg8[%c0, %c0_1] : memref<16x32xf32, #tpu.memory_space<vmem>>, vector<16x32xf32>
    %c0_2 = arith.constant 0 : index
    %c0_3 = arith.constant 0 : index
    %4 = vector.load %arg3[%c0_2, %c0_3] : memref<32x32xf32, #tpu.memory_space<vmem>>, vector<32x32xf32>
    %cst = arith.constant dense<0.000000e+00> : vector<16x32xf32>
    %5 = tpu.matmul %3, %4, %cst {dimension_numbers = #tpu.dot_dimension_numbers<[1], [0], [0], [1], [0, 0, 1, 1], [], []>} : vector<16x32xf32>, vector<32x32xf32>, vector<16x32xf32> -> vector<16x32xf32>
    %c0_4 = arith.constant 0 : index
    %c0_5 = arith.constant 0 : index
    %6 = vector.load %arg4[%c0_4, %c0_5] : memref<1x32xf32, #tpu.memory_space<vmem>>, vector<1x32xf32>
    %7 = vector.broadcast %6 : vector<1x32xf32> to vector<16x32xf32>
    %8 = arith.addf %5, %7 : vector<16x32xf32>
    %c0_6 = arith.constant 0 : index
    %c0_7 = arith.constant 0 : index
    %9 = vector.load %arg2[%c0_6, %c0_7] : memref<16x32xf32, #tpu.memory_space<vmem>>, vector<16x32xf32>
    %10 = arith.addf %9, %8 : vector<16x32xf32>
    %c0_8 = arith.constant 0 : index
    %c0_9 = arith.constant 0 : index
    %11 = vector.load %arg7[%c0_8, %c0_9] : memref<16x32xf32, #tpu.memory_space<vmem>>, vector<16x32xf32>
    tpu.vector_store %arg7[%c0_8, %c0_9], %10 {strides = array<i32>} : memref<16x32xf32, #tpu.memory_space<vmem>>, vector<16x32xf32>,
    return
  }
  func.func @transform_0(%arg0: i32, %arg1: i32) -> (i32, i32) {
    %c0_i32 = arith.constant 0 : i32
    %c0_i32_0 = arith.constant 0 : i32
    return %arg0, %c0_i32 : i32, i32
  }
  func.func @transform_1(%arg0: i32, %arg1: i32) -> (i32, i32) {
    %c0_i32 = arith.constant 0 : i32
    %c0_i32_0 = arith.constant 0 : i32
    return %c0_i32, %arg1 : i32, i32
  }
  func.func @transform_2(%arg0: i32, %arg1: i32) -> (i32, i32) {
    %c0_i32 = arith.constant 0 : i32
    %c0_i32_0 = arith.constant 0 : i32
    return %c0_i32, %arg1 : i32, i32
  }
  func.func @transform_3(%arg0: i32, %arg1: i32) -> (i32, i32) {
    %c0_i32 = arith.constant 0 : i32
    %c0_i32_0 = arith.constant 0 : i32
    %c0_i32_1 = arith.constant 0 : i32
    return %c0_i32, %c0_i32_0 : i32, i32
  }
  func.func @transform_4(%arg0: i32, %arg1: i32) -> (i32, i32) {
    %c0_i32 = arith.constant 0 : i32
    %c0_i32_0 = arith.constant 0 : i32
    %c0_i32_1 = arith.constant 0 : i32
    return %c0_i32, %c0_i32_0 : i32, i32
  }
  func.func @transform_5(%arg0: i32, %arg1: i32) -> (i32, i32) {
    %c0_i32 = arith.constant 0 : i32
    return %arg0, %arg1 : i32, i32
  }
}

</mosaic_0001>

<bundles_post_ra>
// kernel: tpu_custom_call.1
= control target key start
LH: loop header
LB: loop body
LE: loop exit
PB: predicated region body
PF: predicated region fallthrough
CT: control target
= control target key end

     0   :  { %10 = vsyncpa [#allocation4], 0  ;;  %s471_s0 = inlined_call_operand.hbm [shape: f32[16,32], index: 0, kind: input, shape index: {}]   ;;  %s472_s1 = inlined_call_operand.hbm [shape: f32[32,32], index: 1, kind: input, shape index: {}]   ;;  %s473_s2 = inlined_call_operand.vmem [shape: f32[1,32], index: 2, kind: input, shape index: {}]   ;;  %s474_s3 = inlined_call_operand.vmem [shape: f32[1,32], index: 3, kind: input, shape index: {}]   ;;  %s475_s4 = inlined_call_operand.vmem [shape: f32[1,32], index: 4, kind: input, shape index: {}]   ;;  %s476_s5 = inlined_call_operand.hbm [shape: f32[16,32], index: 5, kind: output, shape index: {}]  }
   0x1   :  { %11 = vsyncpa [#allocation7], 0 }
   0x2   :  { %12 = vsyncpa [#allocation5], 0  ;;  %s358_s18 = smov [#allocation3]   ;;  %s286_s22 = scalar_lea.hbm %s471_s0, 256 }
   0x3   :  { %s18_s19 = sshll.u32 %s358_s18, 4  ;;  %p287_p0 = scmp.ne.s32.totalorder %s471_s0, %s286_s22  ;;  %s19_s19 = int_to_ptr.vmem [resolvable:$true] %s18_s19 }
   0x4   :  { %p290_p1 = scmp.lt.u32.totalorder %s286_s22, %s471_s0 }
   0x6   :  { %p292_p2 = pnand %p290_p1, %p287_p0 }
   0x8   :  { %295 = shalt.err (!%p292_p2)
}
   0x9   :  { %s296_s27 = scalar_lea.vmem %s19_s19, 256  ;;  %p301_p4 = scmp.lt.s32.totalorder %s19_s19, %s19_s19 }
   0xa   :  { %p297_p3 = scmp.ne.s32.totalorder %s19_s19, %s296_s27  ;;  %p302_p5 = scmp.lt.s32.totalorder %s296_s27, %s296_s27 }
   0xc   :  { %p303_p6 = por %p302_p5, %p301_p4 }
   0xe   :  { %p304_p7 = pnand %p303_p6, %p297_p3 }
  0x10   :  { %307 = shalt.err (!%p304_p7)
}
  0x11   :  { %s359_s28 = smov 128   ;;  %s360_s29 = smov 8  }
  0x12   :  { %24 = dma.hbm_to_vmem [thread:$0]  %s471_s0, 256, %s19_s19, [#allocation4], %s359_s28, %s359_s28, %s360_s29  }
  0x13   :  { %s361_s7 = smov [#allocation6]   ;;  %s308_s11 = scalar_lea.hbm %s472_s1, 512 }
  0x14   :  { %s30_s8 = sshll.u32 %s361_s7, 4  ;;  %p309_p8 = scmp.ne.s32.totalorder %s472_s1, %s308_s11  ;;  %s31_s8 = int_to_ptr.vmem [resolvable:$true] %s30_s8 }
  0x15   :  { %p312_p9 = scmp.lt.u32.totalorder %s308_s11, %s472_s1 }
  0x17   :  { %p314_p10 = pnand %p312_p9, %p309_p8 }
  0x19   :  { %317 = shalt.err (!%p314_p10)
}
  0x1a   :  { %s318_s16 = scalar_lea.vmem %s31_s8, 512  ;;  %p323_p12 = scmp.lt.s32.totalorder %s31_s8, %s31_s8 }
  0x1b   :  { %p319_p11 = scmp.ne.s32.totalorder %s31_s8, %s318_s16  ;;  %p324_p13 = scmp.lt.s32.totalorder %s318_s16, %s318_s16 }
  0x1d   :  { %p325_p0 = por %p324_p13, %p323_p12 }
  0x1f   :  { %p326_p1 = pnand %p325_p0, %p319_p11 }
  0x21   :  { %329 = shalt.err (!%p326_p1)
}
  0x22   :  { %36 = dma.hbm_to_vmem [thread:$0]  %s472_s1, 512, %s31_s8, [#allocation7], %s359_s28, %s359_s28, %s360_s29  }
  0x23   :  { %352 = dma.done.wait [#allocation4], 256  }
  0x24   :  { %353 = vsyncadd [#allocation4], 4294967040 }
  0x25   :  { %354 = dma.done.wait [#allocation7], 512  }
  0x26   :  { %355 = vsyncadd [#allocation7], 4294966784  ;;  %vm55_vm0 = vcmask 261120   ;;  %v423_v0 = vld [vmem:[#allocation3] sm:$0xff]  ;;  %v425_v1 = vld [vmem:[#allocation3 + $0x8] sm:$0xff] }
  0x27   :  { %v56_v2 = vsel %vm55_vm0, %v423_v0, 0.0  ;;  %v62_v3 = vmul.f32 %v423_v0, %v423_v0  ;;  %v63_v4 = vmul.f32 %v425_v1, %v425_v1  ;;  %v59_v5 = vsel %vm55_vm0, %v425_v1, 0.0  ;;  %v126_v8 = vld [vmem:[#allocation6] sm:$0xff]  ;;  %v127_v9 = vld [vmem:[#allocation6 + $0x8] sm:$0xff]  ;;  %v128_v11 = vld [vmem:[#allocation6 + $0x10] sm:$0xff] }
  0x28   :  { %57 = vadd.xlane.f32.xlu0 %v56_v2  ;;  %v265_v10 = vpack.c.bf16 %v127_v9, %v126_v8  ;;  %v129_v12 = vld [vmem:[#allocation6 + $0x18] sm:$0xff]  ;;  %v243_v43 = vld [vmem:[%s474_s3] ss:$0 sm:$0xff] }
  0x29   :  { %v64_v6 = vsel %vm55_vm0, %v62_v3, 0.0  ;;  %v67_v7 = vsel %vm55_vm0, %v63_v4, 0.0  ;;  %v269_v13 = vpack.c.bf16 %v129_v12, %v128_v11  ;;  %v244_v47 = vld [vmem:[%s475_s4] ss:$0 sm:$0xff]  ;;  %s362_s4 = smov [#allocation8]  }
  0x2a   :  { %65 = vadd.xlane.f32.xlu1 %v64_v6  ;;  %266 = vmatprep.subr.bf16.mxu0 %v265_v10  ;;  %v245_v56 = vld [vmem:[%s473_s2] ss:$0 sm:$0xff]  ;;  %s230_s22 = sshll.u32 %s362_s4, 4  ;;  %s231_s22 = int_to_ptr.vmem [resolvable:$true] %s230_s22 }
  0x2b   :  { %268 = vmatpush3.bf16.msra.mxu0 %v265_v10  ;;  %s330_s23 = scalar_lea.vmem %s231_s22, 256  ;;  %p335_p3 = scmp.lt.s32.totalorder %s231_s22, %s231_s22 }
  0x2c   :  { %60 = vadd.xlane.f32.xlu0 %v59_v5  ;;  %270 = vmatprep.subr.bf16.mxu0 %v269_v13  ;;  %p331_p2 = scmp.ne.s32.totalorder %s231_s22, %s330_s23  ;;  %p336_p4 = scmp.lt.s32.totalorder %s330_s23, %s330_s23 }
  0x2e   :  { %68 = vadd.xlane.f32.xlu1 %v67_v7  ;;  %p337_p5 = por %p336_p4, %p335_p3 }
  0x2f   :  { %272 = vmatpush3.bf16.msra.mxu0 %v269_v13 }
  0x30   :  { %p338_p6 = pnand %p337_p5, %p331_p2 }
  0xb5   :  { %v58_v14 = vpop.xlane.xlu0 %57 }
  0xb6   :  { %v70_v15 = vmul.f32 0.03125, %v58_v14 }
  0xb7   :  { %v66_v16 = vpop.xlane.xlu1 %65 }
  0xb8   :  { %v72_v17 = vmul.f32 32.0, %v70_v15  ;;  %v96_v42 = vsub.f32 %v423_v0, %v70_v15 }
  0xb9   :  { %v61_v18 = vpop.xlane.xlu0 %60 }
  0xba   :  { %v71_v19 = vmul.f32 0.03125, %v61_v18  ;;  %v74_v20 = vmul.f32 %v72_v17, %v70_v15  ;;  %v105_v44 = vmul.f32 %v243_v43, %v96_v42 }
  0xbb   :  { %v69_v23 = vpop.xlane.xlu1 %68 }
  0xbc   :  { %v73_v21 = vmul.f32 32.0, %v71_v19  ;;  %v76_v22 = vsub.f32 %v66_v16, %v74_v20  ;;  %v97_v46 = vsub.f32 %v425_v1, %v71_v19 }
  0xbe   :  { %v78_v24 = vmul.f32 0.032258064, %v76_v22  ;;  %v75_v25 = vmul.f32 %v73_v21, %v71_v19  ;;  %v106_v50 = vmul.f32 %v243_v43, %v97_v46 }
  0xc0   :  { %v80_v26 = vmax.f32 %v78_v24, 0.0  ;;  %v77_v27 = vsub.f32 %v69_v23, %v75_v25 }
  0xc2   :  { %278 = vrsqrt.f32 %v80_v26  ;;  %v79_v28 = vmul.f32 0.032258064, %v77_v27  ;;  %vm84_vm1 = vcmp.eq.f32.partialorder %v80_v26, inf  ;;  %v87_v32 = vand.u32 2147483648, %v80_v26 }
  0xc3   :  { %vm86_vm2 = vcmp.eq.f32.partialorder %v80_v26, 0.0 }
  0xc4   :  { %v81_v29 = vmax.f32 %v79_v28, 0.0 }
  0xc6   :  { %280 = vrsqrt.f32 %v81_v29  ;;  %vm91_vm3 = vcmp.eq.f32.partialorder %v81_v29, inf  ;;  %v94_v38 = vand.u32 2147483648, %v81_v29  ;;  %vm93_vm4 = vcmp.eq.f32.partialorder %v81_v29, 0.0 }
  0xcc   :  { %v279_v30 = vpop.eup %278 }
  0xcd   :  { %v83_v31 = vmul.f32 %v279_v30, %v80_v26 }
  0xcf   :  { %v85_v33 = vsel %vm84_vm1, %v80_v26, %v83_v31 }
  0xd0   :  { %v88_v34 = vsel %vm86_vm2, %v87_v32, %v85_v33  ;;  %v281_v35 = vpop.eup %280 }
  0xd1   :  { %v107_v36 = vadd.f32 1e-06, %v88_v34  ;;  %v90_v37 = vmul.f32 %v281_v35, %v81_v29 }
  0xd3   :  { %282 = vrcp.f32 %v107_v36  ;;  %v92_v39 = vsel %vm91_vm3, %v81_v29, %v90_v37 }
  0xd4   :  { %v95_v40 = vsel %vm93_vm4, %v94_v38, %v92_v39 }
  0xd5   :  { %v108_v41 = vadd.f32 1e-06, %v95_v40 }
  0xd7   :  { %284 = vrcp.f32 %v108_v41 }
  0xdd   :  { %v283_v45 = vpop.eup %282 }
  0xde   :  { %v110_v48 = vmul.f32 %v283_v45, %v105_v44 }
  0xe0   :  { %v120_v49 = vadd.f32 %v244_v47, %v110_v48 }
  0xe1   :  { %v285_v51 = vpop.eup %284 }
  0xe2   :  { %122 = vst.msk [vmem:[#allocation2] sm:$0xff] %vm55_vm0, %v120_v49  ;;  %v112_v52 = vmul.f32 %v285_v51, %v106_v50 }
  0xe4   :  { %v121_v53 = vadd.f32 %v244_v47, %v112_v52 }
  0xe6   :  { %123 = vst.msk [vmem:[#allocation2 + $0x8] sm:$0xff] %vm55_vm0, %v121_v53 }
  0xe9   :  { %v124_v54 = vld [vmem:[#allocation2] sm:$0xff] }
  0xea   :  { %262 = vmatprep.mubr.msk.f32.mxu0 %vm55_vm0, %v124_v54 }
  0xed   :  { %v125_v55 = vld [vmem:[#allocation2 + $0x8] sm:$0xff] }
  0xee   :  { %263 = vmatmul.mubr.msk.f32.vlgmr.msra.gmra.mrb[0].mxu0 %vm55_vm0, %v125_v55 }
 0x1c1   :  { %v264_v57 = vpop.f32.mrb[0].mxu0 }
 0x1c2   :  { %v216_v58 = vadd.f32 %v264_v57, %v245_v56  ;;  %v210_v59 = vpop.f32.mrb[1].mxu0 }
 0x1c3   :  { %v211_v60 = vadd.f32 %v245_v56, %v210_v59 }
 0x1c4   :  { %v222_v61 = vadd.f32 %v216_v58, %v425_v1 }
 0x1c5   :  { %v221_v62 = vadd.f32 %v211_v60, %v423_v0 }
 0x1c6   :  { %224 = vst.msk [vmem:[#allocation8 + $0x8] sm:$0xff] %vm55_vm0, %v222_v61 }
 0x1c7   :  { %223 = vst.msk [vmem:[#allocation8] sm:$0xff] %vm55_vm0, %v221_v62 }
 0x1c8   :  { %341 = shalt.err (!%p338_p6)
}
 0x1c9   :  { %s342_s25 = scalar_lea.hbm %s476_s5, 256 }
 0x1ca   :  { %p343_p7 = scmp.ne.s32.totalorder %s476_s5, %s342_s25  ;;  %p346_p8 = scmp.lt.u32.totalorder %s342_s25, %s476_s5 }
 0x1cc   :  { %p348_p9 = pnand %p346_p8, %p343_p7 }
 0x1ce   :  { %351 = shalt.err (!%p348_p9)
}
 0x1cf   :  { %236 = dma.vmem_to_hbm [thread:$0]  %s231_s22, 256, %s476_s5, [#allocation5], %s359_s28, %s359_s28, %s360_s29  }
 0x1d0   :  { %356 = dma.done.wait [#allocation5], 256  }
 0x1d1   :  { %357 = vsyncadd [#allocation5], 4294967040 }
 0x1d2   :  { %240 = vsyncpa [#allocation4], 1 }
 0x1d3   :  { %241 = vsyncpa [#allocation7], 1 }
 0x1d4   :  { %242 = vsyncpa [#allocation5], 1 }

// kernel: tpu_custom_call.1
= control target key start
LH: loop header
LB: loop body
LE: loop exit
PB: predicated region body
PF: predicated region fallthrough
CT: control target
= control target key end

     0   :  { %10 = vsyncpa [#allocation4], 0  ;;  %s471_s0 = inlined_call_operand.hbm [shape: f32[16,32], index: 0, kind: input, shape index: {}]   ;;  %s472_s1 = inlined_call_operand.hbm [shape: f32[32,32], index: 1, kind: input, shape index: {}]   ;;  %s473_s2 = inlined_call_operand.vmem [shape: f32[1,32], index: 2, kind: input, shape index: {}]   ;;  %s474_s3 = inlined_call_operand.vmem [shape: f32[1,32], index: 3, kind: input, shape index: {}]   ;;  %s475_s4 = inlined_call_operand.vmem [shape: f32[1,32], index: 4, kind: input, shape index: {}]   ;;  %s476_s5 = inlined_call_operand.hbm [shape: f32[16,32], index: 5, kind: output, shape index: {}]  }
   0x1   :  { %11 = vsyncpa [#allocation7], 0 }
   0x2   :  { %12 = vsyncpa [#allocation5], 0  ;;  %s358_s18 = smov [#allocation3]   ;;  %s286_s22 = scalar_lea.hbm %s471_s0, 256 }
   0x3   :  { %s18_s19 = sshll.u32 %s358_s18, 4  ;;  %p287_p0 = scmp.ne.s32.totalorder %s471_s0, %s286_s22  ;;  %s19_s19 = int_to_ptr.vmem [resolvable:$true] %s18_s19 }
   0x4   :  { %p290_p1 = scmp.lt.u32.totalorder %s286_s22, %s471_s0 }
   0x6   :  { %p292_p2 = pnand %p290_p1, %p287_p0 }
   0x8   :  { %295 = shalt.err (!%p292_p2)
}
   0x9   :  { %s296_s27 = scalar_lea.vmem %s19_s19, 256  ;;  %p301_p4 = scmp.lt.s32.totalorder %s19_s19, %s19_s19 }
   0xa   :  { %p297_p3 = scmp.ne.s32.totalorder %s19_s19, %s296_s27  ;;  %p302_p5 = scmp.lt.s32.totalorder %s296_s27, %s296_s27 }
   0xc   :  { %p303_p6 = por %p302_p5, %p301_p4 }
   0xe   :  { %p304_p7 = pnand %p303_p6, %p297_p3 }
  0x10   :  { %307 = shalt.err (!%p304_p7)
}
  0x11   :  { %s359_s28 = smov 128   ;;  %s360_s29 = smov 8  }
  0x12   :  { %24 = dma.hbm_to_vmem [thread:$0]  %s471_s0, 256, %s19_s19, [#allocation4], %s359_s28, %s359_s28, %s360_s29  }
  0x13   :  { %s361_s7 = smov [#allocation6]   ;;  %s308_s11 = scalar_lea.hbm %s472_s1, 512 }
  0x14   :  { %s30_s8 = sshll.u32 %s361_s7, 4  ;;  %p309_p8 = scmp.ne.s32.totalorder %s472_s1, %s308_s11  ;;  %s31_s8 = int_to_ptr.vmem [resolvable:$true] %s30_s8 }
  0x15   :  { %p312_p9 = scmp.lt.u32.totalorder %s308_s11, %s472_s1 }
  0x17   :  { %p314_p10 = pnand %p312_p9, %p309_p8 }
  0x19   :  { %317 = shalt.err (!%p314_p10)
}
  0x1a   :  { %s318_s16 = scalar_lea.vmem %s31_s8, 512  ;;  %p323_p12 = scmp.lt.s32.totalorder %s31_s8, %s31_s8 }
  0x1b   :  { %p319_p11 = scmp.ne.s32.totalorder %s31_s8, %s318_s16  ;;  %p324_p13 = scmp.lt.s32.totalorder %s318_s16, %s318_s16 }
  0x1d   :  { %p325_p0 = por %p324_p13, %p323_p12 }
  0x1f   :  { %p326_p1 = pnand %p325_p0, %p319_p11 }
  0x21   :  { %329 = shalt.err (!%p326_p1)
}
  0x22   :  { %36 = dma.hbm_to_vmem [thread:$0]  %s472_s1, 512, %s31_s8, [#allocation7], %s359_s28, %s359_s28, %s360_s29  }
  0x23   :  { %352 = dma.done.wait [#allocation4], 256  }
  0x24   :  { %353 = vsyncadd [#allocation4], 4294967040 }
  0x25   :  { %354 = dma.done.wait [#allocation7], 512  }
  0x26   :  { %355 = vsyncadd [#allocation7], 4294966784  ;;  %vm55_vm0 = vcmask 261120   ;;  %v423_v0 = vld [vmem:[#allocation3] sm:$0xff]  ;;  %v425_v1 = vld [vmem:[#allocation3 + $0x8] sm:$0xff] }
  0x27   :  { %v56_v2 = vsel %vm55_vm0, %v423_v0, 0.0  ;;  %v62_v3 = vmul.f32 %v423_v0, %v423_v0  ;;  %v63_v4 = vmul.f32 %v425_v1, %v425_v1  ;;  %v59_v5 = vsel %vm55_vm0, %v425_v1, 0.0  ;;  %v126_v8 = vld [vmem:[#allocation6] sm:$0xff]  ;;  %v127_v9 = vld [vmem:[#allocation6 + $0x8] sm:$0xff]  ;;  %v128_v11 = vld [vmem:[#allocation6 + $0x10] sm:$0xff] }
  0x28   :  { %57 = vadd.xlane.f32.xlu0 %v56_v2  ;;  %v265_v10 = vpack.c.bf16 %v127_v9, %v126_v8  ;;  %v129_v12 = vld [vmem:[#allocation6 + $0x18] sm:$0xff]  ;;  %v243_v43 = vld [vmem:[%s474_s3] ss:$0 sm:$0xff] }
  0x29   :  { %v64_v6 = vsel %vm55_vm0, %v62_v3, 0.0  ;;  %v67_v7 = vsel %vm55_vm0, %v63_v4, 0.0  ;;  %v269_v13 = vpack.c.bf16 %v129_v12, %v128_v11  ;;  %v244_v47 = vld [vmem:[%s475_s4] ss:$0 sm:$0xff]  ;;  %s362_s4 = smov [#allocation8]  }
  0x2a   :  { %65 = vadd.xlane.f32.xlu1 %v64_v6  ;;  %266 = vmatprep.subr.bf16.mxu0 %v265_v10  ;;  %v245_v56 = vld [vmem:[%s473_s2] ss:$0 sm:$0xff]  ;;  %s230_s22 = sshll.u32 %s362_s4, 4  ;;  %s231_s22 = int_to_ptr.vmem [resolvable:$true] %s230_s22 }
  0x2b   :  { %268 = vmatpush3.bf16.msra.mxu0 %v265_v10  ;;  %s330_s23 = scalar_lea.vmem %s231_s22, 256  ;;  %p335_p3 = scmp.lt.s32.totalorder %s231_s22, %s231_s22 }
  0x2c   :  { %60 = vadd.xlane.f32.xlu0 %v59_v5  ;;  %270 = vmatprep.subr.bf16.mxu0 %v269_v13  ;;  %p331_p2 = scmp.ne.s32.totalorder %s231_s22, %s330_s23  ;;  %p336_p4 = scmp.lt.s32.totalorder %s330_s23, %s330_s23 }
  0x2e   :  { %68 = vadd.xlane.f32.xlu1 %v67_v7  ;;  %p337_p5 = por %p336_p4, %p335_p3 }
  0x2f   :  { %272 = vmatpush3.bf16.msra.mxu0 %v269_v13 }
  0x30   :  { %p338_p6 = pnand %p337_p5, %p331_p2 }
  0xb5   :  { %v58_v14 = vpop.xlane.xlu0 %57 }
  0xb6   :  { %v70_v15 = vmul.f32 0.03125, %v58_v14 }
  0xb7   :  { %v66_v16 = vpop.xlane.xlu1 %65 }
  0xb8   :  { %v72_v17 = vmul.f32 32.0, %v70_v15  ;;  %v96_v42 = vsub.f32 %v423_v0, %v70_v15 }
  0xb9   :  { %v61_v18 = vpop.xlane.xlu0 %60 }
  0xba   :  { %v71_v19 = vmul.f32 0.03125, %v61_v18  ;;  %v74_v20 = vmul.f32 %v72_v17, %v70_v15  ;;  %v105_v44 = vmul.f32 %v243_v43, %v96_v42 }
  0xbb   :  { %v69_v23 = vpop.xlane.xlu1 %68 }
  0xbc   :  { %v73_v21 = vmul.f32 32.0, %v71_v19  ;;  %v76_v22 = vsub.f32 %v66_v16, %v74_v20  ;;  %v97_v46 = vsub.f32 %v425_v1, %v71_v19 }
  0xbe   :  { %v78_v24 = vmul.f32 0.032258064, %v76_v22  ;;  %v75_v25 = vmul.f32 %v73_v21, %v71_v19  ;;  %v106_v50 = vmul.f32 %v243_v43, %v97_v46 }
  0xc0   :  { %v80_v26 = vmax.f32 %v78_v24, 0.0  ;;  %v77_v27 = vsub.f32 %v69_v23, %v75_v25 }
  0xc2   :  { %278 = vrsqrt.f32 %v80_v26  ;;  %v79_v28 = vmul.f32 0.032258064, %v77_v27  ;;  %vm84_vm1 = vcmp.eq.f32.partialorder %v80_v26, inf  ;;  %v87_v32 = vand.u32 2147483648, %v80_v26 }
  0xc3   :  { %vm86_vm2 = vcmp.eq.f32.partialorder %v80_v26, 0.0 }
  0xc4   :  { %v81_v29 = vmax.f32 %v79_v28, 0.0 }
  0xc6   :  { %280 = vrsqrt.f32 %v81_v29  ;;  %vm91_vm3 = vcmp.eq.f32.partialorder %v81_v29, inf  ;;  %v94_v38 = vand.u32 2147483648, %v81_v29  ;;  %vm93_vm4 = vcmp.eq.f32.partialorder %v81_v29, 0.0 }
  0xcc   :  { %v279_v30 = vpop.eup %278 }
  0xcd   :  { %v83_v31 = vmul.f32 %v279_v30, %v80_v26 }
  0xcf   :  { %v85_v33 = vsel %vm84_vm1, %v80_v26, %v83_v31 }
  0xd0   :  { %v88_v34 = vsel %vm86_vm2, %v87_v32, %v85_v33  ;;  %v281_v35 = vpop.eup %280 }
  0xd1   :  { %v107_v36 = vadd.f32 1e-06, %v88_v34  ;;  %v90_v37 = vmul.f32 %v281_v35, %v81_v29 }
  0xd3   :  { %282 = vrcp.f32 %v107_v36  ;;  %v92_v39 = vsel %vm91_vm3, %v81_v29, %v90_v37 }
  0xd4   :  { %v95_v40 = vsel %vm93_vm4, %v94_v38, %v92_v39 }
  0xd5   :  { %v108_v41 = vadd.f32 1e-06, %v95_v40 }
  0xd7   :  { %284 = vrcp.f32 %v108_v41 }
  0xdd   :  { %v283_v45 = vpop.eup %282 }
  0xde   :  { %v110_v48 = vmul.f32 %v283_v45, %v105_v44 }
  0xe0   :  { %v120_v49 = vadd.f32 %v244_v47, %v110_v48 }
  0xe1   :  { %v285_v51 = vpop.eup %284 }
  0xe2   :  { %122 = vst.msk [vmem:[#allocation2] sm:$0xff] %vm55_vm0, %v120_v49  ;;  %v112_v52 = vmul.f32 %v285_v51, %v106_v50 }
  0xe4   :  { %v121_v53 = vadd.f32 %v244_v47, %v112_v52 }
  0xe6   :  { %123 = vst.msk [vmem:[#allocation2 + $0x8] sm:$0xff] %vm55_vm0, %v121_v53 }
  0xe9   :  { %v124_v54 = vld [vmem:[#allocation2] sm:$0xff] }
  0xea   :  { %262 = vmatprep.mubr.msk.f32.mxu0 %vm55_vm0, %v124_v54 }
  0xed   :  { %v125_v55 = vld [vmem:[#allocation2 + $0x8] sm:$0xff] }
  0xee   :  { %263 = vmatmul.mubr.msk.f32.vlgmr.msra.gmra.mrb[0].mxu0 %vm55_vm0, %v125_v55 }
 0x1c1   :  { %v264_v57 = vpop.f32.mrb[0].mxu0 }
 0x1c2   :  { %v216_v58 = vadd.f32 %v264_v57, %v245_v56  ;;  %v210_v59 = vpop.f32.mrb[1].mxu0 }
 0x1c3   :  { %v211_v60 = vadd.f32 %v245_v56, %v210_v59 }
 0x1c4   :  { %v222_v61 = vadd.f32 %v216_v58, %v425_v1 }
 0x1c5   :  { %v221_v62 = vadd.f32 %v211_v60, %v423_v0 }
 0x1c6   :  { %224 = vst.msk [vmem:[#allocation8 + $0x8] sm:$0xff] %vm55_vm0, %v222_v61 }
 0x1c7   :  { %223 = vst.msk [vmem:[#allocation8] sm:$0xff] %vm55_vm0, %v221_v62 }
 0x1c8   :  { %341 = shalt.err (!%p338_p6)
}
 0x1c9   :  { %s342_s25 = scalar_lea.hbm %s476_s5, 256 }
 0x1ca   :  { %p343_p7 = scmp.ne.s32.totalorder %s476_s5, %s342_s25  ;;  %p346_p8 = scmp.lt.u32.totalorder %s342_s25, %s476_s5 }
 0x1cc   :  { %p348_p9 = pnand %p346_p8, %p343_p7 }
 0x1ce   :  { %351 = shalt.err (!%p348_p9)
}
 0x1cf   :  { %236 = dma.vmem_to_hbm [thread:$0]  %s231_s22, 256, %s476_s5, [#allocation5], %s359_s28, %s359_s28, %s360_s29  }
 0x1d0   :  { %356 = dma.done.wait [#allocation5], 256  }
 0x1d1   :  { %357 = vsyncadd [#allocation5], 4294967040 }
 0x1d2   :  { %240 = vsyncpa [#allocation4], 1 }
 0x1d3   :  { %241 = vsyncpa [#allocation7], 1 }
 0x1d4   :  { %242 = vsyncpa [#allocation5], 1 }

</bundles_post_ra>
